<compile_context>
chip_gen: v7x
topology: tpu7x:2x2x1
jax: 0.10.0
libtpu: 0.0.40
codegen_flags: <defaults>
</compile_context>

<pallas_src>
import math
import functools

import jax
import jax.numpy as jnp
from jax import lax
from jax.experimental import pallas as pl
from jax.experimental.pallas import tpu as pltpu


# ---------------------------------------------------------------------------
# Kernel 1: fused 1x1-conv projections for Q, K, V (once per (batch, N-tile)).
# ---------------------------------------------------------------------------
def _proj_kernel(num_heads, head_dim,
                 q_ref, k_ref, v_ref,
                 wq_ref, bq_ref, wk_ref, bk_ref, wv_ref, bv_ref,
                 qo_ref, ko_ref, vo_ref):
    # q/k/v blocks: (1, d_model, tn) bf16; weights (d_model, d_model) bf16;
    # biases (d_model, 1) f32; outputs (1, H, head_dim, tn) bf16.
    def proj(w_ref, b_ref, x_ref, o_ref):
        y = jnp.dot(w_ref[...], x_ref[0],
                    preferred_element_type=jnp.float32) + b_ref[...]
        tn = y.shape[-1]
        # Head split on the f32 result (cheap sublane-axis split), then cast.
        o_ref[0] = y.reshape(num_heads, head_dim, tn).astype(o_ref.dtype)

    proj(wq_ref, bq_ref, q_ref, qo_ref)
    proj(wk_ref, bk_ref, k_ref, ko_ref)
    proj(wv_ref, bv_ref, v_ref, vo_ref)


# ---------------------------------------------------------------------------
# Kernel 2: per-(batch, q-tile) attention + merge projection.
# ---------------------------------------------------------------------------
def _attn_kernel(has_mask, q_ref, k_ref, v_ref, *rest):
    if has_mask:
        mask_ref, wm_ref, bm_ref, o_ref = rest
    else:
        mask_ref = None
        wm_ref, bm_ref, o_ref = rest

    q3 = q_ref[0]                       # (H, head_dim, tq)  bf16
    k3 = k_ref[0]                       # (H, head_dim, n)   bf16
    v3 = v_ref[0]                       # (H, head_dim, n)   bf16
    num_heads, head_dim, tq = q3.shape

    # scores[h, n, m] = sum_d q3[h, d, n] * k3[h, d, m]
    # (1/sqrt(head_dim) is pre-folded into wq/bq; no transposes; f32 accum.)
    s = lax.dot_general(
        q3, k3,
        dimension_numbers=(((1,), (1,)), ((0,), (0,))),
        preferred_element_type=jnp.float32)            # (H, tq, n)

    if mask_ref is not None:
        s = s + mask_ref[...]                          # additive (1, n) mask

    # Softmax over keys, in f32 (v5e-safe).
    s = s - jnp.max(s, axis=-1, keepdims=True)
    e = jnp.exp(s)
    denom = jnp.sum(e, axis=-1, keepdims=True)
    p = e * pl.reciprocal(denom, approx=True)          # (H, tq, n)

    # x[h, d, n] = sum_m v3[h, d, m] * p[h, n, m]
    x = lax.dot_general(
        v3, p.astype(jnp.bfloat16),
        dimension_numbers=(((2,), (2,)), ((0,), (0,))),
        preferred_element_type=jnp.float32)            # (H, head_dim, tq)
    x = x.reshape(num_heads * head_dim, tq)            # head-contiguous merge

    out = jnp.dot(wm_ref[...], x.astype(jnp.bfloat16),
                  preferred_element_type=jnp.float32) + bm_ref[...]
    o_ref[0] = out.astype(o_ref.dtype)


# ---------------------------------------------------------------------------
# Wrapper
# ---------------------------------------------------------------------------
def multi_headed_attention(q, k, v, params, *, num_heads):
    """q, k, v: (B, d_model, N) float32.  params: dict of weights/biases."""
    B, d_model, N = q.shape
    assert d_model % num_heads == 0
    head_dim = d_model // num_heads
    assert d_model % 8 == 0, "d_model must be a multiple of 8 (f32 sublane)"

    # Hardware-aware tile / VMEM-limit choice (v7x has 64 MiB, v5e/v6e 128).
    try:
        vmem_bytes = int(pltpu.get_tpu_info().vmem_capacity_bytes)
    except Exception:
        vmem_bytes = 64 * 1024 * 1024
    vmem_limit = int(min(100 * 2**20, max(32 * 2**20, (vmem_bytes * 3) // 4)))
    tq_cap = 512 if vmem_bytes >= 96 * 2**20 else 256

    # Pad the lane axis (N) to a multiple of 128 for lane-dense blocks.
    n_pad = ((N + 127) // 128) * 128
    if n_pad != N:
        pad = ((0, 0), (0, 0), (0, n_pad - N))
        q = jnp.pad(q, pad)
        k = jnp.pad(k, pad)
        v = jnp.pad(v, pad)

    def pick_tile(cap):
        for t in (cap, 256, 128):
            if t <= n_pad and n_pad % t == 0:
                return t
        return 128

    tq = pick_tile(tq_cap)   # attention query tile
    tn = pick_tile(512)      # projection N tile
    num_q_tiles = n_pad // tq

    # bf16 MXU operands; accumulation stays f32 in-kernel.
    q = q.astype(jnp.bfloat16)
    k = k.astype(jnp.bfloat16)
    v = v.astype(jnp.bfloat16)

    # Permute projection rows / merge columns so channels are head-contiguous
    # (new channel i = h*head_dim + d  <-  old channel d*num_heads + h) and
    # fold the attention scale into the Q projection.  Biases stay f32.
    perm = jnp.arange(d_model).reshape(head_dim, num_heads).T.reshape(-1)
    scale = 1.0 / math.sqrt(head_dim)
    wq = (params["wq"][perm, :] * scale).astype(jnp.bfloat16)
    bq = params["bq"][perm, :] * scale
    wk = params["wk"][perm, :].astype(jnp.bfloat16)
    bk = params["bk"][perm, :]
    wv = params["wv"][perm, :].astype(jnp.bfloat16)
    bv = params["bv"][perm, :]
    wm = params["wm"][:, perm].astype(jnp.bfloat16)
    bm = params["bm"]

    w_spec = pl.BlockSpec((d_model, d_model), lambda b, t: (0, 0))
    bias_spec = pl.BlockSpec((d_model, 1), lambda b, t: (0, 0))

    # ------------------------------------------------------------------
    # Pass 1: Q/K/V projections, written once (bf16, head-contiguous).
    # ------------------------------------------------------------------
    x_spec = pl.BlockSpec((1, d_model, tn), lambda b, t: (b, 0, t))
    p_out_spec = pl.BlockSpec((1, num_heads, head_dim, tn),
                              lambda b, t: (b, 0, 0, t))
    p_out_shape = jax.ShapeDtypeStruct((B, num_heads, head_dim, n_pad),
                                       jnp.bfloat16)

    qp, kp, vp = pl.pallas_call(
        functools.partial(_proj_kernel, num_heads, head_dim),
        out_shape=(p_out_shape, p_out_shape, p_out_shape),
        grid_spec=pltpu.PrefetchScalarGridSpec(
            num_scalar_prefetch=0,
            grid=(B, n_pad // tn),
            in_specs=[x_spec, x_spec, x_spec,
                      w_spec, bias_spec, w_spec, bias_spec, w_spec, bias_spec],
            out_specs=[p_out_spec, p_out_spec, p_out_spec],
        ),
        compiler_params=pltpu.CompilerParams(
            dimension_semantics=("parallel", "parallel"),
            vmem_limit_bytes=vmem_limit),
    )(q, k, v, wq, bq, wk, bk, wv, bv)

    # ------------------------------------------------------------------
    # Pass 2: attention + merge projection over (batch, q-tile).
    # ------------------------------------------------------------------
    has_mask = n_pad != N
    q_spec = pl.BlockSpec((1, num_heads, head_dim, tq),
                          lambda b, t: (b, 0, 0, t))
    kv_spec = pl.BlockSpec((1, num_heads, head_dim, n_pad),
                           lambda b, t: (b, 0, 0, 0))
    o_spec = pl.BlockSpec((1, d_model, tq), lambda b, t: (b, 0, t))

    inputs = [qp, kp, vp]
    in_specs = [q_spec, kv_spec, kv_spec]
    if has_mask:
        mask = jnp.where(jnp.arange(n_pad) < N, 0.0, -1e30)
        mask = mask.astype(jnp.float32).reshape(1, n_pad)
        inputs.append(mask)
        in_specs.append(pl.BlockSpec((1, n_pad), lambda b, t: (0, 0)))
    inputs += [wm, bm]
    in_specs += [w_spec, bias_spec]

    flops = B * (4 * d_model * n_pad * n_pad + 2 * d_model * d_model * n_pad)
    transcendentals = B * num_heads * n_pad * n_pad
    bytes_accessed = (B * 3 * d_model * n_pad * 2      # bf16 qp/kp/vp reads
                      + B * d_model * n_pad * 4        # f32 output
                      + d_model * d_model * 2 + d_model * 4)

    out = pl.pallas_call(
        functools.partial(_attn_kernel, has_mask),
        out_shape=jax.ShapeDtypeStruct((B, d_model, n_pad), jnp.float32),
        grid_spec=pltpu.PrefetchScalarGridSpec(
            num_scalar_prefetch=0,
            grid=(B, num_q_tiles),
            in_specs=in_specs,
            out_specs=o_spec,
        ),
        compiler_params=pltpu.CompilerParams(
            dimension_semantics=("parallel", "parallel"),
            vmem_limit_bytes=vmem_limit),
        cost_estimate=pl.CostEstimate(
            flops=flops, transcendentals=transcendentals,
            bytes_accessed=bytes_accessed),
    )(*inputs)

    return out[:, :, :N]


# ---------------------------------------------------------------------------
# Pure-JAX f32 reference matching the PyTorch module semantics.
# ---------------------------------------------------------------------------
def reference_mha(q, k, v, params, *, num_heads):
    B, d_model, N = q.shape
    head_dim = d_model // num_heads

    def conv1x1(w, b, x):
        return jnp.einsum('oi,bin->bon', w, x) + b[None, :, :]

    qp = conv1x1(params["wq"], params["bq"], q).reshape(B, head_dim, num_heads, N)
    kp = conv1x1(params["wk"], params["bk"], k).reshape(B, head_dim, num_heads, N)
    vp = conv1x1(params["wv"], params["bv"], v).reshape(B, head_dim, num_heads, N)

    scores = jnp.einsum('bdhn,bdhm->bhnm', qp, kp) / math.sqrt(head_dim)
    prob = jax.nn.softmax(scores, axis=-1)
    x = jnp.einsum('bhnm,bdhm->bdhn', prob, vp)
    x = x.reshape(B, d_model, N)
    return conv1x1(params["wm"], params["bm"], x)


def init_params(key, d_model):
    # Deterministic synthetic init (Conv1d-like uniform scale 1/sqrt(fan_in)).
    ks = jax.random.split(key, 8)
    bound = 1.0 / math.sqrt(d_model)

    def u(kk, shape):
        return jax.random.uniform(kk, shape, jnp.float32, -bound, bound)

    return {
        "wq": u(ks[0], (d_model, d_model)), "bq": u(ks[1], (d_model, 1)),
        "wk": u(ks[2], (d_model, d_model)), "bk": u(ks[3], (d_model, 1)),
        "wv": u(ks[4], (d_model, d_model)), "bv": u(ks[5], (d_model, 1)),
        "wm": u(ks[6], (d_model, d_model)), "bm": u(ks[7], (d_model, 1)),
    }


if __name__ == "__main__":
    def run_case(B, d_model, N, num_heads):
        key = jax.random.PRNGKey(0)
        kq, kk, kv, kp = jax.random.split(key, 4)
        q = jax.random.normal(kq, (B, d_model, N), jnp.float32)
        k = jax.random.normal(kk, (B, d_model, N), jnp.float32)
        v = jax.random.normal(kv, (B, d_model, N), jnp.float32)
        params = init_params(kp, d_model)

        out = multi_headed_attention(q, k, v, params, num_heads=num_heads)
        out = jax.block_until_ready(out)
        ref = reference_mha(q, k, v, params, num_heads=num_heads)
        assert out.shape == (B, d_model, N)
        # Tolerance reflects bf16 MXU operands (f32 accumulation), bf16
        # probabilities for PV, and the approx EUP reciprocal.
        assert jnp.allclose(out, ref, atol=5e-2, rtol=5e-2), (
            f"mismatch vs reference (B={B}, d_model={d_model}, N={N})")

    # Primary small case: padded keys -> additive-mask path, single q-tile.
    run_case(B=2, d_model=32, N=16, num_heads=4)
    # Multi-q-tile case with N a multiple of 128 -> mask-free path.
    run_case(B=2, d_model=64, N=384, num_heads=4)

    print("KERNEL_OK")
</pallas_src>

<mosaic_0001>
module attributes {stable_mosaic.version = 11 : i64} {
  func.func @_proj_kernel(%arg0: i32, %arg1: i32, %arg2: memref<1x32x128xbf16, #tpu.memory_space<vmem>>, %arg3: memref<1x32x128xbf16, #tpu.memory_space<vmem>>, %arg4: memref<1x32x128xbf16, #tpu.memory_space<vmem>>, %arg5: memref<32x32xbf16, #tpu.memory_space<vmem>>, %arg6: memref<32x1xf32, #tpu.memory_space<vmem>>, %arg7: memref<32x32xbf16, #tpu.memory_space<vmem>>, %arg8: memref<32x1xf32, #tpu.memory_space<vmem>>, %arg9: memref<32x32xbf16, #tpu.memory_space<vmem>>, %arg10: memref<32x1xf32, #tpu.memory_space<vmem>>, %arg11: memref<1x4x8x128xbf16, #tpu.memory_space<vmem>>, %arg12: memref<1x4x8x128xbf16, #tpu.memory_space<vmem>>, %arg13: memref<1x4x8x128xbf16, #tpu.memory_space<vmem>>) attributes {dimension_semantics = [#tpu.dimension_semantics<parallel>, #tpu.dimension_semantics<parallel>], iteration_bounds = array<i64: 2, 1>, scalar_prefetch = 0 : i64, scratch_operands = 0 : i64, tpu.core_type = #tpu.core_type<tc>, window_params = [{transform_indices = @transform_0, window_bounds = array<i64: 1, 32, 128>}, {transform_indices = @transform_1, window_bounds = array<i64: 1, 32, 128>}, {transform_indices = @transform_2, window_bounds = array<i64: 1, 32, 128>}, {pipeline_mode = #tpu.pipeline_mode<synchronous>, transform_indices = @transform_3, window_bounds = array<i64: 32, 32>}, {pipeline_mode = #tpu.pipeline_mode<synchronous>, transform_indices = @transform_4, window_bounds = array<i64: 32, 1>}, {pipeline_mode = #tpu.pipeline_mode<synchronous>, transform_indices = @transform_5, window_bounds = array<i64: 32, 32>}, {pipeline_mode = #tpu.pipeline_mode<synchronous>, transform_indices = @transform_6, window_bounds = array<i64: 32, 1>}, {pipeline_mode = #tpu.pipeline_mode<synchronous>, transform_indices = @transform_7, window_bounds = array<i64: 32, 32>}, {pipeline_mode = #tpu.pipeline_mode<synchronous>, transform_indices = @transform_8, window_bounds = array<i64: 32, 1>}, {transform_indices = @transform_9, window_bounds = array<i64: 1, 4, 8, 128>}, {transform_indices = @transform_10, window_bounds = array<i64: 1, 4, 8, 128>}, {transform_indices = @transform_11, window_bounds = array<i64: 1, 4, 8, 128>}]} {
    %c0 = arith.constant 0 : index
    %c0_0 = arith.constant 0 : index
    %0 = vector.load %arg5[%c0, %c0_0] : memref<32x32xbf16, #tpu.memory_space<vmem>>, vector<32x32xbf16>
    %c0_1 = arith.constant 0 : index
    %c0_2 = arith.constant 0 : index
    %c0_3 = arith.constant 0 : index
    %1 = vector.load %arg2[%c0_1, %c0_2, %c0_3] : memref<1x32x128xbf16, #tpu.memory_space<vmem>>, vector<1x32x128xbf16>
    %2 = vector.shape_cast %1 : vector<1x32x128xbf16> to vector<32x128xbf16>
    %cst = arith.constant dense<0.000000e+00> : vector<32x128xf32>
    %3 = tpu.matmul %0, %2, %cst {dimension_numbers = #tpu.dot_dimension_numbers<[1], [0], [0], [1], [0, 0, 1, 1], [], []>} : vector<32x32xbf16>, vector<32x128xbf16>, vector<32x128xf32> -> vector<32x128xf32>
    %c0_4 = arith.constant 0 : index
    %c0_5 = arith.constant 0 : index
    %4 = vector.load %arg6[%c0_4, %c0_5] : memref<32x1xf32, #tpu.memory_space<vmem>>, vector<32x1xf32>
    %5 = vector.broadcast %4 : vector<32x1xf32> to vector<32x128xf32>
    %6 = arith.addf %3, %5 : vector<32x128xf32>
    %7 = vector.shape_cast %6 : vector<32x128xf32> to vector<4x8x128xf32>
    %8 = arith.truncf %7 : vector<4x8x128xf32> to vector<4x8x128xbf16>
    %c0_6 = arith.constant 0 : index
    %c0_7 = arith.constant 0 : index
    %c0_8 = arith.constant 0 : index
    %c0_9 = arith.constant 0 : index
    %9 = vector.load %arg11[%c0_6, %c0_7, %c0_8, %c0_9] : memref<1x4x8x128xbf16, #tpu.memory_space<vmem>>, vector<1x4x8x128xbf16>
    %10 = vector.shape_cast %9 : vector<1x4x8x128xbf16> to vector<4x8x128xbf16>
    %11 = vector.shape_cast %8 : vector<4x8x128xbf16> to vector<1x4x8x128xbf16>
    tpu.vector_store %arg11[%c0_6, %c0_7, %c0_8, %c0_9], %11 {strides = array<i32>} : memref<1x4x8x128xbf16, #tpu.memory_space<vmem>>, vector<1x4x8x128xbf16>,
    %c0_10 = arith.constant 0 : index
    %c0_11 = arith.constant 0 : index
    %12 = vector.load %arg7[%c0_10, %c0_11] : memref<32x32xbf16, #tpu.memory_space<vmem>>, vector<32x32xbf16>
    %c0_12 = arith.constant 0 : index
    %c0_13 = arith.constant 0 : index
    %c0_14 = arith.constant 0 : index
    %13 = vector.load %arg3[%c0_12, %c0_13, %c0_14] : memref<1x32x128xbf16, #tpu.memory_space<vmem>>, vector<1x32x128xbf16>
    %14 = vector.shape_cast %13 : vector<1x32x128xbf16> to vector<32x128xbf16>
    %cst_15 = arith.constant dense<0.000000e+00> : vector<32x128xf32>
    %15 = tpu.matmul %12, %14, %cst_15 {dimension_numbers = #tpu.dot_dimension_numbers<[1], [0], [0], [1], [0, 0, 1, 1], [], []>} : vector<32x32xbf16>, vector<32x128xbf16>, vector<32x128xf32> -> vector<32x128xf32>
    %c0_16 = arith.constant 0 : index
    %c0_17 = arith.constant 0 : index
    %16 = vector.load %arg8[%c0_16, %c0_17] : memref<32x1xf32, #tpu.memory_space<vmem>>, vector<32x1xf32>
    %17 = vector.broadcast %16 : vector<32x1xf32> to vector<32x128xf32>
    %18 = arith.addf %15, %17 : vector<32x128xf32>
    %19 = vector.shape_cast %18 : vector<32x128xf32> to vector<4x8x128xf32>
    %20 = arith.truncf %19 : vector<4x8x128xf32> to vector<4x8x128xbf16>
    %c0_18 = arith.constant 0 : index
    %c0_19 = arith.constant 0 : index
    %c0_20 = arith.constant 0 : index
    %c0_21 = arith.constant 0 : index
    %21 = vector.load %arg12[%c0_18, %c0_19, %c0_20, %c0_21] : memref<1x4x8x128xbf16, #tpu.memory_space<vmem>>, vector<1x4x8x128xbf16>
    %22 = vector.shape_cast %21 : vector<1x4x8x128xbf16> to vector<4x8x128xbf16>
    %23 = vector.shape_cast %20 : vector<4x8x128xbf16> to vector<1x4x8x128xbf16>
    tpu.vector_store %arg12[%c0_18, %c0_19, %c0_20, %c0_21], %23 {strides = array<i32>} : memref<1x4x8x128xbf16, #tpu.memory_space<vmem>>, vector<1x4x8x128xbf16>,
    %c0_22 = arith.constant 0 : index
    %c0_23 = arith.constant 0 : index
    %24 = vector.load %arg9[%c0_22, %c0_23] : memref<32x32xbf16, #tpu.memory_space<vmem>>, vector<32x32xbf16>
    %c0_24 = arith.constant 0 : index
    %c0_25 = arith.constant 0 : index
    %c0_26 = arith.constant 0 : index
    %25 = vector.load %arg4[%c0_24, %c0_25, %c0_26] : memref<1x32x128xbf16, #tpu.memory_space<vmem>>, vector<1x32x128xbf16>
    %26 = vector.shape_cast %25 : vector<1x32x128xbf16> to vector<32x128xbf16>
    %cst_27 = arith.constant dense<0.000000e+00> : vector<32x128xf32>
    %27 = tpu.matmul %24, %26, %cst_27 {dimension_numbers = #tpu.dot_dimension_numbers<[1], [0], [0], [1], [0, 0, 1, 1], [], []>} : vector<32x32xbf16>, vector<32x128xbf16>, vector<32x128xf32> -> vector<32x128xf32>
    %c0_28 = arith.constant 0 : index
    %c0_29 = arith.constant 0 : index
    %28 = vector.load %arg10[%c0_28, %c0_29] : memref<32x1xf32, #tpu.memory_space<vmem>>, vector<32x1xf32>
    %29 = vector.broadcast %28 : vector<32x1xf32> to vector<32x128xf32>
    %30 = arith.addf %27, %29 : vector<32x128xf32>
    %31 = vector.shape_cast %30 : vector<32x128xf32> to vector<4x8x128xf32>
    %32 = arith.truncf %31 : vector<4x8x128xf32> to vector<4x8x128xbf16>
    %c0_30 = arith.constant 0 : index
    %c0_31 = arith.constant 0 : index
    %c0_32 = arith.constant 0 : index
    %c0_33 = arith.constant 0 : index
    %33 = vector.load %arg13[%c0_30, %c0_31, %c0_32, %c0_33] : memref<1x4x8x128xbf16, #tpu.memory_space<vmem>>, vector<1x4x8x128xbf16>
    %34 = vector.shape_cast %33 : vector<1x4x8x128xbf16> to vector<4x8x128xbf16>
    %35 = vector.shape_cast %32 : vector<4x8x128xbf16> to vector<1x4x8x128xbf16>
    tpu.vector_store %arg13[%c0_30, %c0_31, %c0_32, %c0_33], %35 {strides = array<i32>} : memref<1x4x8x128xbf16, #tpu.memory_space<vmem>>, vector<1x4x8x128xbf16>,
    return
  }
  func.func @transform_0(%arg0: i32, %arg1: i32) -> (i32, i32, i32) {
    %c0_i32 = arith.constant 0 : i32
    %c0_i32_0 = arith.constant 0 : i32
    return %arg0, %c0_i32, %arg1 : i32, i32, i32
  }
  func.func @transform_1(%arg0: i32, %arg1: i32) -> (i32, i32, i32) {
    %c0_i32 = arith.constant 0 : i32
    %c0_i32_0 = arith.constant 0 : i32
    return %arg0, %c0_i32, %arg1 : i32, i32, i32
  }
  func.func @transform_2(%arg0: i32, %arg1: i32) -> (i32, i32, i32) {
    %c0_i32 = arith.constant 0 : i32
    %c0_i32_0 = arith.constant 0 : i32
    return %arg0, %c0_i32, %arg1 : i32, i32, i32
  }
  func.func @transform_3(%arg0: i32, %arg1: i32) -> (i32, i32) {
    %c0_i32 = arith.constant 0 : i32
    %c0_i32_0 = arith.constant 0 : i32
    %c0_i32_1 = arith.constant 0 : i32
    return %c0_i32, %c0_i32_0 : i32, i32
  }
  func.func @transform_4(%arg0: i32, %arg1: i32) -> (i32, i32) {
    %c0_i32 = arith.constant 0 : i32
    %c0_i32_0 = arith.constant 0 : i32
    %c0_i32_1 = arith.constant 0 : i32
    return %c0_i32, %c0_i32_0 : i32, i32
  }
  func.func @transform_5(%arg0: i32, %arg1: i32) -> (i32, i32) {
    %c0_i32 = arith.constant 0 : i32
    %c0_i32_0 = arith.constant 0 : i32
    %c0_i32_1 = arith.constant 0 : i32
    return %c0_i32, %c0_i32_0 : i32, i32
  }
  func.func @transform_6(%arg0: i32, %arg1: i32) -> (i32, i32) {
    %c0_i32 = arith.constant 0 : i32
    %c0_i32_0 = arith.constant 0 : i32
    %c0_i32_1 = arith.constant 0 : i32
    return %c0_i32, %c0_i32_0 : i32, i32
  }
  func.func @transform_7(%arg0: i32, %arg1: i32) -> (i32, i32) {
    %c0_i32 = arith.constant 0 : i32
    %c0_i32_0 = arith.constant 0 : i32
    %c0_i32_1 = arith.constant 0 : i32
    return %c0_i32, %c0_i32_0 : i32, i32
  }
  func.func @transform_8(%arg0: i32, %arg1: i32) -> (i32, i32) {
    %c0_i32 = arith.constant 0 : i32
    %c0_i32_0 = arith.constant 0 : i32
    %c0_i32_1 = arith.constant 0 : i32
    return %c0_i32, %c0_i32_0 : i32, i32
  }
  func.func @transform_9(%arg0: i32, %arg1: i32) -> (i32, i32, i32, i32) {
    %c0_i32 = arith.constant 0 : i32
    %c0_i32_0 = arith.constant 0 : i32
    %c0_i32_1 = arith.constant 0 : i32
    return %arg0, %c0_i32, %c0_i32_0, %arg1 : i32, i32, i32, i32
  }
  func.func @transform_10(%arg0: i32, %arg1: i32) -> (i32, i32, i32, i32) {
    %c0_i32 = arith.constant 0 : i32
    %c0_i32_0 = arith.constant 0 : i32
    %c0_i32_1 = arith.constant 0 : i32
    return %arg0, %c0_i32, %c0_i32_0, %arg1 : i32, i32, i32, i32
  }
  func.func @transform_11(%arg0: i32, %arg1: i32) -> (i32, i32, i32, i32) {
    %c0_i32 = arith.constant 0 : i32
    %c0_i32_0 = arith.constant 0 : i32
    %c0_i32_1 = arith.constant 0 : i32
    return %arg0, %c0_i32, %c0_i32_0, %arg1 : i32, i32, i32, i32
  }
}

</mosaic_0001>

<bundles_post_ra>
// kernel: tpu_custom_call.1
= control target key start
LH: loop header
LB: loop body
LE: loop exit
PB: predicated region body
PF: predicated region fallthrough
CT: control target
= control target key end

     0   :  { %17 = vsyncpa [#allocation3], 0  ;;  %s1986_s0 = inlined_call_operand.vmem [shape: bf16[2,32,128], index: 0, kind: input, shape index: {}]   ;;  %s1987_s1 = inlined_call_operand.vmem [shape: bf16[2,32,128], index: 1, kind: input, shape index: {}]   ;;  %s1988_s2 = inlined_call_operand.vmem [shape: bf16[2,32,128], index: 2, kind: input, shape index: {}]   ;;  %s1989_s3 = inlined_call_operand.hbm [shape: bf16[32,32], index: 3, kind: input, shape index: {}]   ;;  %s1990_s4 = inlined_call_operand.vmem [shape: f32[32,1], index: 4, kind: input, shape index: {}]   ;;  %s1991_s5 = inlined_call_operand.vmem [shape: bf16[32,32], index: 5, kind: input, shape index: {}]   ;;  %s1992_s6 = inlined_call_operand.vmem [shape: f32[32,1], index: 6, kind: input, shape index: {}]   ;;  %s1993_s7 = inlined_call_operand.hbm [shape: bf16[32,32], index: 7, kind: input, shape index: {}]   ;;  %s1994_s8 = inlined_call_operand.vmem [shape: f32[32,1], index: 8, kind: input, shape index: {}]   ;;  %s1995_s9 = inlined_call_operand.hbm [shape: bf16[2,4,8,128], index: 9, kind: output, shape index: {0}]   ;;  %s1996_s10 = inlined_call_operand.hbm [shape: bf16[2,4,8,128], index: 10, kind: output, shape index: {1}]   ;;  %s1997_s11 = inlined_call_operand.hbm [shape: bf16[2,4,8,128], index: 11, kind: output, shape index: {2}]  }
   0x1   :  { %18 = vsyncpa [#allocation6], 0 }
   0x2   :  { %19 = vsyncpa [#allocation4], 0 }
   0x3   :  { %21 = vsyncpa [#allocation4 + $0x1], 0 }
   0x4   :  { %22 = vsyncpa [#allocation9], 0 }
   0x5   :  { %24 = vsyncpa [#allocation9 + $0x1], 0  ;;  %s1638_s17 = smov 0   ;;  %s1640_s18 = smov 0  }
   0x6   :  { %s1642_s19 = smov 0   ;;  %s1644_s20 = smov 0  }
   0x7   :  { %s1646_s21 = smov 0   ;;  %s1648_s22 = smov 0  }
   0x8 LB: > { %2009 = sst [smem:[#allocation15_spill]] %s1546_s17  ;;  %s1669_s23 = sadd.s32 4294967295, %s1566_s22   ;;  %s1566_s22 = sphi %s1648_s22, %s30_s22   ;;  %s1562_s21 = sphi %s1646_s21, %s2034_s21   ;;  %s1558_s20 = sphi %s1644_s20, %s2033_s20   ;;  %s1554_s19 = sphi %s1642_s19, %s2032_s19   ;;  %s1550_s18 = sphi %s1640_s18, %s2036_s18   ;;  %s1546_s17 = sphi %s1638_s17, %s2035_s17  }
   0x9   : > { %2010 = sst [smem:[#allocation16_spill]] %s1554_s19  ;;  %s1998_s24 = sadd.s32 4294967294, %s1566_s22  }
   0xa   : > { %2011 = sst [smem:[#allocation17_spill]] %s1562_s21  ;;  %s42_s25 = sadd.s32 1, %s1562_s21 }
   0xb   : > { %2012 = sst [smem:[#allocation18_spill]] %s1566_s22  ;;  %s261_s26 = sadd.s32 1, %s1554_s19 }
   0xc   : > { %p44_p0 = scmp.ge.s32.totalorder %s42_s25, 2  ;;  %p271_p1 = scmp.ne.s32.totalorder %s1554_s19, %s1550_s18 }
   0xd   : > { %p272_p2 = scmp.eq.s32.totalorder %s1669_s23, 1  ;;  %p277_p3 = scmp.ne.s32.totalorder %s1550_s18, %s1546_s17 }
   0xe   : > { %s2038_s25 = smov (%p44_p0, %s42_s25), 0  ;;  %p278_p5 = scmp.eq.s32.totalorder %s1998_s24, 1 }
   0xf   : > { %2013 = sst [smem:[#allocation19_spill]] %s2038_s25  ;;  %p1681_p4 = por %p272_p2, %p271_p1 }
  0x10   : > { %s256_s28 = ssub.s32 %s1562_s21, %s2038_s25  ;;  %p1139_p6 = scmp.ge.s32.totalorder %s1566_s22, 1 }
  0x11   : > { %s2014_s27 = scalar_select %p1681_p4, 1, 0 }
  0x12   : > { %p259_p7 = scmp.eq.s32.totalorder %s256_s28, 0  ;;  %p1690_p8 = por %p278_p5, %p277_p3 }
  0x13   : > { %p341_p9 = scmp.lt.s32.totalorder %s1566_s22, 3  ;;  %p2002_p11 = scmp.eq.s32.totalorder %s1669_s23, 0 }
  0x14   : > { %s2015_s29 = scalar_select %p1690_p8, 1, 0 }
  0x15   : > { %s1696_s30 = scalar_select %p259_p7, %s1554_s19, %s261_s26  }
  0x16   : > { %2016 = sst [smem:[#allocation20_spill]] %s2015_s29  ;;  %p1698_p10 = pnand %p1139_p6, %p341_p9 }
  0x17   : > { %2017 = sst [smem:[#allocation21_spill]] %s1696_s30  ;;  %s1568_s13 = smov [#allocation2]  }
  0x18   : > { %s2018_s12 = scalar_select %p1698_p10, 1, 0 }
  0x19   : > { %p1273_p12 = pneg %p1698_p10  ;;  %s353_s14 = sshll.u32 %s1568_s13, 4  ;;  %s354_s14 = int_to_ptr.vmem [resolvable:$true] %s353_s14 }
  0x1a   : > { %s1569_s16 = smov [#allocation5]   ;;  %s1364_s25 = scalar_lea.hbm %s1989_s3, 256 }
  0x1b   : > { %p1707_p13 = pnand %p2002_p11, %p1273_p12  ;;  %s375_s26 = sshll.u32 %s1569_s16, 4  ;;  %s1711_s26 = int_to_ptr.vmem [resolvable:$true] %s375_s26 }
  0x1c   : > { %p1365_p0 = scmp.ne.s32.totalorder %s1989_s3, %s1364_s25  ;;  %p1371_p5 = scmp.lt.u32.totalorder %s1364_s25, %s1989_s3 }
  0x1d   : > { %p1366_p1 = pneg %p1707_p13 }
  0x1f   : > { %p1367_p2 = pnand %p1366_p1, %p1365_p0 }
  0x21   : > { %p1368_p3 = pneg %p1367_p2 }
  0x23   : > { %p1373_p6 = pnand %p1371_p5, %p1368_p3 }
  0x25   : > { %1376 = shalt.err (!%p1373_p6)
}
  0x26   : > { %s1377_s16 = scalar_lea.vmem %s354_s14, 256  ;;  %p1385_p11 = scmp.lt.s32.totalorder %s354_s14, %s354_s14 }
  0x27   : > { %p1378_p7 = scmp.ne.s32.totalorder %s354_s14, %s1377_s16  ;;  %p1386_p8 = scmp.lt.s32.totalorder %s1377_s16, %s1377_s16 }
  0x29   : > { %p1380_p9 = pnand %p1378_p7, %p1366_p1  ;;  %p1387_p4 = por %p1386_p8, %p1385_p11 }
  0x2b   : > { %p1381_p12 = pneg %p1380_p9 }
  0x2d   : > { %p1388_p10 = pnand %p1387_p4, %p1381_p12 }
  0x2f   : > { %1391 = shalt.err (!%p1388_p10)
}
  0x30   : > { %s1570_s21 = smov 64   ;;  %s1571_s24 = smov 4  }
  0x31   : > { %1276 = dma.hbm_to_vmem [thread:$0]  (!%p1707_p13), %s1989_s3, 256, %s354_s14, [#allocation3], %s1570_s21, %s1570_s21, %s1571_s24  }
  0x32   : > { %s1392_s13 = scalar_lea.hbm %s1993_s7, 256 }
  0x33   : > { %p1393_p0 = scmp.ne.s32.totalorder %s1993_s7, %s1392_s13  ;;  %p1399_p10 = scmp.lt.u32.totalorder %s1392_s13, %s1993_s7 }
  0x35   : > { %p1395_p4 = pnand %p1393_p0, %p1366_p1 }
  0x37   : > { %p1396_p8 = pneg %p1395_p4 }
  0x39   : > { %p1401_p11 = pnand %p1399_p10, %p1396_p8 }
  0x3b   : > { %1404 = shalt.err (!%p1401_p11)
}
  0x3c   : > { %s1405_s14 = scalar_lea.vmem %s1711_s26, 256  ;;  %p1413_p6 = scmp.lt.s32.totalorder %s1711_s26, %s1711_s26 }
  0x3d   : > { %p1406_p2 = scmp.ne.s32.totalorder %s1711_s26, %s1405_s14  ;;  %p1414_p7 = scmp.lt.s32.totalorder %s1405_s14, %s1405_s14 }
  0x3f   : > { %p1408_p3 = pnand %p1406_p2, %p1366_p1  ;;  %p1415_p9 = por %p1414_p7, %p1413_p6 }
  0x41   : > { %p1409_p5 = pneg %p1408_p3 }
  0x43   : > { %p1416_p12 = pnand %p1415_p9, %p1409_p5 }
  0x45   : > { %1419 = shalt.err (!%p1416_p12)
}
  0x46   : > { %1279 = dma.hbm_to_vmem [thread:$0]  (!%p1707_p13), %s1993_s7, 256, %s1711_s26, [#allocation6], %s1570_s21, %s1570_s21, %s1571_s24  }
  0x47   : > { %p2020_p0 = scmp.ne.s32.totalorder %s2018_s12, 0 }
  0x48   : > { %p2021_p4 = scmp.eq.s32.totalorder (!%p2020_p0), %s1669_s23, 0 }
  0x49   : > { %427 = sbr.rel (%p2020_p0) target bundleno = 382 (0x17e), region = 56 }
  0x50   : > { %1529 = dma.done.wait (%p2021_p4), [#allocation3], 256   ;;  %p2022_p1 = pmov %p2021_p4 }
  0x52   : > { %1531 = vsyncadd (%p2022_p1), [#allocation3], 4294967040  ;;  %p2023_p8 = pmov %p2022_p1 }
  0x53   : > { %p2024_p10 = pmov %p2022_p1 }
  0x54   : > { %1533 = dma.done.wait (%p2023_p8), [#allocation6], 256  }
  0x55   : > { %1535 = vsyncadd (%p2024_p10), [#allocation6], 4294967040  ;;  %p500_p11 = scmp.lt.s32.totalorder %s1558_s20, 1  ;;  %v1572_v0 = vmov 0   ;;  %vm579_vm0 = vcmask 261120   ;;  %v1356_v5 = vld [vmem:[#allocation2] sm:$0xff]  }
  0x56   : > { %1351 = vset.pattern.permute.xlu1 %v1572_v0  ;;  %1350 = vset.pattern.permute.xlu0 %v1572_v0  ;;  %v1357_v6 = vld [vmem:[%s1991_s5] sm:$0xff]   ;;  %v1358_v7 = vld [vmem:[#allocation2 + $0x8] sm:$0xff]   ;;  %v1362_v11 = vld [vmem:[#allocation5] sm:$0xff]   ;;  %s483_s28 = sand.u32 1, %s1550_s18   ;;  %p2025_p2 = scmp.ne.s32.totalorder %s2014_s27, 0 }
  0x57   : > { %s501_s29 = scalar_select %p500_p11, %s1558_s20, 1  ;;  %1239 = vmatprep.mubr.msk.bf16.mxu0 %vm579_vm0, %v1356_v5  ;;  %1247 = vmatprep.mubr.msk.bf16.mxu1 %vm579_vm0, %v1357_v6  ;;  %v1359_v8 = vld [vmem:[%s1991_s5 + $0x8] sm:$0xff]   ;;  %v653_v12 = vld [vmem:[%s1992_s6 + $0x10] sm:$0xff]  ;;  %v651_v13 = vld [vmem:[%s1992_s6] sm:$0xff] }
  0x58   : > { %667 = vperm.xlu1 %1351, %v653_v12   ;;  %657 = vperm.xlu0 %1350, %v651_v13   ;;  %v1363_v14 = vld [vmem:[#allocation5 + $0x8] sm:$0xff]   ;;  %v652_v16 = vld [vmem:[%s1992_s6 + $0x8] sm:$0xff]  ;;  %v533_v18 = vld [vmem:[%s1990_s4] sm:$0xff]  ;;  %s1832_s13 = sshll.u32 %s483_s28, 4 }
  0x59   : > { %s1184_s12 = sshll.u32 %s501_s29, 4  ;;  %v654_v15 = vld [vmem:[%s1992_s6 + $0x18] sm:$0xff]  ;;  %v534_v17 = vld [vmem:[%s1990_s4 + $0x8] sm:$0xff]  ;;  %v535_v20 = vld [vmem:[%s1990_s4 + $0x10] sm:$0xff]  ;;  %s1837_s16 = scalar_lea.vmem [#allocation7], %s1832_s13 }
  0x5a   : > { %s507_s21 = scalar_lea.vmem %s1986_s0, %s1184_s12  ;;  %s515_s25 = scalar_lea.vmem %s1987_s1, %s1184_s12  ;;  %v536_v19 = vld [vmem:[%s1990_s4 + $0x18] sm:$0xff]  ;;  %v769_v21 = vld [vmem:[%s1994_s8 + $0x8] sm:$0xff]  ;;  %v768_v22 = vld [vmem:[%s1994_s8] sm:$0xff] }
  0x5b   : > { %v1352_v1 = vld [vmem:[%s507_s21] sm:$0xff]   ;;  %v1354_v3 = vld [vmem:[%s507_s21 + $0x8] sm:$0xff]   ;;  %s523_s14 = scalar_lea.vmem %s1988_s2, %s1184_s12  ;;  %v771_v23 = vld [vmem:[%s1994_s8 + $0x18] sm:$0xff]  ;;  %s492_s17 = scalar_lea.vmem [#allocation8], %s1832_s13 }
  0x5c   : > { %v1353_v2 = vld [vmem:[%s515_s25] sm:$0xff]   ;;  %1235 = vmatprep.subr.bf16.mxu0 %v1352_v1  ;;  %v1355_v4 = vld [vmem:[%s515_s25 + $0x8] sm:$0xff]   ;;  %672 = vperm.xlu1 %1351, %v654_v15   ;;  %v770_v24 = vld [vmem:[%s1994_s8 + $0x10] sm:$0xff]  ;;  %s919_s22 = sshll.u32 %s492_s17, 4  ;;  %s1842_s29 = sshll.u32 %s1558_s20, 8  ;;  %s1849_s22 = int_to_ptr.vmem [resolvable:$true] %s919_s22 }
  0x5d   : > { %1243 = vmatprep.subr.bf16.mxu1 %v1353_v2  ;;  %1236 = vmatpush3.bf16.msra.mxu0 %v1352_v1  ;;  %v1360_v9 = vld [vmem:[%s523_s14] sm:$0xff]   ;;  %v1361_v10 = vld [vmem:[%s523_s14 + $0x8] sm:$0xff]   ;;  %s902_s14 = sshll.u32 %s1837_s16, 4  ;;  %s882_s12 = sand.u32 1, %s1669_s23   ;;  %s1846_s14 = int_to_ptr.vmem [resolvable:$true] %s902_s14 }
  0x5e   : > { %1244 = vmatpush3.bf16.msra.mxu1 %v1353_v2  ;;  %1237 = vmatprep.subr.bf16.mxu0 %v1354_v3  ;;  %s1855_s26 = scalar_lea.hbm %s1995_s9, %s1842_s29  ;;  %s1862_s19 = scalar_lea.hbm %s1996_s10, %s1842_s29 }
  0x5f   : > { %1245 = vmatprep.subr.bf16.mxu1 %v1355_v4  ;;  %662 = vperm.xlu0 %1350, %v652_v16   ;;  %s1869_s25 = scalar_lea.sflag [#allocation4], %s483_s28  ;;  %s1420_s30 = scalar_lea.vmem %s1846_s14, 256 }
  0x60   : > { %544 = vperm.xlu1 %1351, %v534_v17   ;;  %p1421_p13 = scmp.ne.s32.totalorder %s1846_s14, %s1420_s30  ;;  %s1573_s20 = smov [#allocation7]  }
  0x61   : > { %1238 = vmatpush3.bf16.msra.mxu0 %v1354_v3  ;;  %s1424_s15 = sshll.u32 %s1573_s20, 4  ;;  %s1425_s15 = int_to_ptr.vmem [resolvable:$false] %s1424_s15 }
  0x62   : > { %1246 = vmatpush3.bf16.msra.mxu1 %v1355_v4  ;;  %1251 = vmatprep.subr.bf16.mxu0 %v1360_v9  ;;  %p1422_p3 = pnand %p1421_p13, %p2025_p2  ;;  %s1426_s21 = scalar_lea.vmem %s1425_s15, 512 }
  0x63   : > { %539 = vperm.xlu0 %1350, %v533_v18   ;;  %p1427_p6 = scmp.lt.s32.totalorder %s1846_s14, %s1425_s15  ;;  %p1428_p7 = scmp.lt.s32.totalorder %s1426_s21, %s1420_s30 }
  0x64   : > { %1240 = vmatmul.mubr.msk.bf16.vlgmr.msra.gmra.mrb[0].mxu0 %vm579_vm0, %v1358_v7  ;;  %554 = vperm.xlu1 %1351, %v536_v19   ;;  %p1423_p5 = pneg %p1422_p3 }
  0x65   : > { %1248 = vmatmul.mubr.msk.bf16.vlgmr.msra.gmra.mrb[0].mxu1 %vm579_vm0, %v1359_v8  ;;  %1252 = vmatpush3.bf16.msra.mxu0 %v1360_v9  ;;  %p1429_p9 = por %p1428_p7, %p1427_p6 }
  0x66   : > { %1253 = vmatprep.subr.bf16.mxu0 %v1361_v10  ;;  %1255 = vmatprep.mubr.msk.bf16.mxu0 %vm579_vm0, %v1362_v11 }
  0x67   : > { %549 = vperm.xlu0 %1350, %v535_v20   ;;  %p1430_p12 = pnand %p1429_p9, %p1423_p5 }
  0x68   : > { %779 = vperm.xlu1 %1351, %v769_v21  }
  0x69   : > { %1254 = vmatpush3.bf16.msra.mxu0 %v1361_v10 }
  0x6b   : > { %774 = vperm.xlu0 %1350, %v768_v22  }
  0x6c   : > { %1256 = vmatmul.mubr.msk.bf16.vlgmr.msra.gmra.mrb[4].mxu0 %vm579_vm0, %v1363_v14  ;;  %789 = vperm.xlu1 %1351, %v771_v23  }
  0x6f   : > { %784 = vperm.xlu0 %1350, %v770_v24  }
  0xd7   : > { %v668_v25 = vpop.permute.xlu1 %667  ;;  %v658_v26 = vpop.permute.xlu0 %657 }
  0xdb   : > { %v673_v27 = vpop.permute.xlu1 %672 }
  0xde   : > { %v663_v28 = vpop.permute.xlu0 %662 }
  0xdf   : > { %v545_v29 = vpop.permute.xlu1 %544 }
  0xe2   : > { %v540_v30 = vpop.permute.xlu0 %539 }
  0xe3   : > { %v555_v31 = vpop.permute.xlu1 %554 }
  0xe6   : > { %v550_v32 = vpop.permute.xlu0 %549 }
  0xe7   : > { %v1834_v33 = vpop.permute.xlu1 %779 }
  0xea   : > { %v1844_v43 = vpop.permute.xlu0 %774 }
  0xeb   : > { %v790_v56 = vpop.permute.xlu1 %789 }
 0x137   : > { %v1241_v34 = vpop.f32.mrb[0].mxu0 }
 0x138   : > { %v1249_v35 = vpop.f32.mrb[0].mxu1  ;;  %v620_v36 = vpop.f32.mrb[1].mxu0  ;;  %v629_v39 = vadd.f32 %v1241_v34, %v550_v32 }
 0x139   : > { %v737_v37 = vpop.f32.mrb[1].mxu1  ;;  %v1242_v38 = vpop.f32.mrb[2].mxu0  ;;  %v746_v44 = vadd.f32 %v1249_v35, %v668_v25  ;;  %v621_v45 = vadd.f32 %v620_v36, %v540_v30 }
 0x13a   : > { %v632_v40 = vadd.f32 %v1242_v38, %v555_v31  ;;  %v1250_v41 = vpop.f32.mrb[2].mxu1  ;;  %v623_v42 = vpop.f32.mrb[3].mxu0  ;;  %v738_v49 = vadd.f32 %v737_v37, %v658_v26 }
 0x13b   : > { %v749_v46 = vadd.f32 %v1250_v41, %v673_v27  ;;  %v624_v47 = vadd.f32 %v623_v42, %v545_v29  ;;  %v740_v48 = vpop.f32.mrb[3].mxu1 }
 0x13c   : > { %v1198_v50 = vpack.c.bf16 %v632_v40, %v629_v39  ;;  %v741_v51 = vadd.f32 %v740_v48, %v663_v28 }
 0x13d   : > { %v1208_v52 = vpack.c.bf16 %v749_v46, %v746_v44  ;;  %v1193_v53 = vpack.c.bf16 %v624_v47, %v621_v45 }
 0x13e   : > { %1220 = vst [vmem:[%s1837_s16 + $0x8] sm:$0xff] %v1198_v50   ;;  %v1203_v54 = vpack.c.bf16 %v741_v51, %v738_v49 }
 0x13f   : > { %1221 = vst [vmem:[%s492_s17 + $0x8] sm:$0xff] %v1208_v52   ;;  %1194 = vst [vmem:[%s1837_s16] sm:$0xff] %v1193_v53   ;;  %v1257_v55 = vpop.f32.mrb[4].mxu0 }
 0x140   : > { %1204 = vst [vmem:[%s492_s17] sm:$0xff] %v1203_v54   ;;  %v1865_v57 = vpop.f32.mrb[5].mxu0 }
 0x141   : > { %1433 = shalt.err (!%p1430_p12)
}
 0x142   : > { %s1434_s28 = scalar_lea.hbm %s1855_s26, 256  ;;  %s1438_s24 = scalar_lea.hbm %s1995_s9, 512 }
 0x143   : > { %p1435_p0 = scmp.ne.s32.totalorder %s1855_s26, %s1434_s28  ;;  %p1439_p8 = scmp.lt.u32.totalorder %s1855_s26, %s1995_s9 }
 0x144   : > { %p1440_p10 = scmp.lt.u32.totalorder %s1438_s24, %s1434_s28  ;;  %p1442_p13 = scmp.lt.u32.totalorder %s1434_s28, %s1855_s26 }
 0x145   : > { %p1436_p4 = pnand %p1435_p0, %p2025_p2 }
 0x146   : > { %p1441_p11 = por %p1440_p10, %p1439_p8 }
 0x147   : > { %p1437_p1 = pneg %p1436_p4 }
 0x148   : > { %p1443_p3 = por %p1442_p13, %p1441_p11 }
 0x14a   : > { %p1444_p5 = pnand %p1443_p3, %p1437_p1 }
 0x14c   : > { %1447 = shalt.err (!%p1444_p5)
}
 0x14d   : > { %s1574_s30 = smov 64   ;;  %s1575_s21 = smov 4   ;;  %v785_v58 = vpop.permute.xlu0 %784  ;;  %v1258_v59 = vpop.f32.mrb[6].mxu0 }
 0x14e   : > { %1267 = dma.vmem_to_hbm [thread:$0]  (%p2025_p2), %s1846_s14, 256, %s1855_s26, %s1869_s25, %s1574_s30, %s1574_s30, %s1575_s21  }
 0x14f   : > { %s1898_s28 = scalar_lea.sflag [#allocation9], %s882_s12  ;;  %s1448_s16 = scalar_lea.vmem %s1849_s22, 256 }
 0x150   : > { %p1449_p6 = scmp.ne.s32.totalorder %s1849_s22, %s1448_s16  ;;  %s1576_s17 = smov [#allocation8]  }
 0x151   : > { %s1452_s24 = sshll.u32 %s1576_s17, 4  ;;  %s1453_s24 = int_to_ptr.vmem [resolvable:$false] %s1452_s24 }
 0x152   : > { %p1450_p7 = pnand %p1449_p6, %p2025_p2  ;;  %s1454_s20 = scalar_lea.vmem %s1453_s24, 512 }
 0x153   : > { %p1455_p12 = scmp.lt.s32.totalorder %s1849_s22, %s1453_s24  ;;  %p1456_p0 = scmp.lt.s32.totalorder %s1454_s20, %s1448_s16 }
 0x154   : > { %p1451_p9 = pneg %p1450_p7 }
 0x155   : > { %p1457_p4 = por %p1456_p0, %p1455_p12 }
 0x157   : > { %p1458_p1 = pnand %p1457_p4, %p1451_p9 }
 0x159   : > { %1461 = shalt.err (!%p1458_p1)
}
 0x15a   : > { %s1462_s23 = scalar_lea.hbm %s1862_s19, 256  ;;  %s1466_s26 = scalar_lea.hbm %s1996_s10, 512 }
 0x15b   : > { %p1463_p8 = scmp.ne.s32.totalorder %s1862_s19, %s1462_s23  ;;  %p1467_p13 = scmp.lt.u32.totalorder %s1862_s19, %s1996_s10 }
 0x15c   : > { %p1468_p3 = scmp.lt.u32.totalorder %s1466_s26, %s1462_s23  ;;  %p1470_p6 = scmp.lt.u32.totalorder %s1462_s23, %s1862_s19 }
 0x15d   : > { %p1464_p10 = pnand %p1463_p8, %p2025_p2 }
 0x15e   : > { %p1469_p5 = por %p1468_p3, %p1467_p13 }
 0x15f   : > { %p1465_p11 = pneg %p1464_p10 }
 0x160   : > { %p1471_p7 = por %p1470_p6, %p1469_p5 }
 0x162   : > { %p1472_p9 = pnand %p1471_p7, %p1465_p11 }
 0x164   : > { %1475 = shalt.err (!%p1472_p9)
}
 0x165   : > { %1268 = dma.vmem_to_hbm [thread:$0]  (%p2025_p2), %s1849_s22, 256, %s1862_s19, %s1898_s28, %s1574_s30, %s1574_s30, %s1575_s21   ;;  %v863_v60 = vadd.f32 %v1257_v55, %v785_v58  ;;  %v866_v61 = vadd.f32 %v1258_v59, %v790_v56  ;;  %v857_v62 = vpop.f32.mrb[7].mxu0  ;;  %v855_v63 = vadd.f32 %v1865_v57, %v1844_v43 }
 0x166   : > { %s499_s16 = scalar_lea.vmem [#allocation10], %s1832_s13  ;;  %v858_v0 = vadd.f32 %v857_v62, %v1834_v33  ;;  %s1935_s19 = scalar_lea.hbm %s1997_s11, %s1842_s29 }
 0x167   : > { %s936_s17 = sshll.u32 %s499_s16, 4  ;;  %v1218_v1 = vpack.c.bf16 %v866_v61, %v863_v60  ;;  %s1577_s20 = smov [#allocation10]   ;;  %s1929_s17 = int_to_ptr.vmem [resolvable:$true] %s936_s17 }
 0x168   : > { %v1213_v2 = vpack.c.bf16 %v858_v0, %v855_v63  ;;  %s1476_s13 = scalar_lea.vmem %s1929_s17, 256  ;;  %s1480_s23 = sshll.u32 %s1577_s20, 4  ;;  %s1481_s23 = int_to_ptr.vmem [resolvable:$false] %s1480_s23 }
 0x169   : > { %1222 = vst [vmem:[%s499_s16 + $0x8] sm:$0xff] %v1218_v1   ;;  %p1477_p12 = scmp.ne.s32.totalorder %s1929_s17, %s1476_s13  ;;  %s1482_s14 = scalar_lea.vmem %s1481_s23, 512 }
 0x16a   : > { %1214 = vst [vmem:[%s499_s16] sm:$0xff] %v1213_v2   ;;  %p1483_p1 = scmp.lt.s32.totalorder %s1929_s17, %s1481_s23  ;;  %p1484_p8 = scmp.lt.s32.totalorder %s1482_s14, %s1476_s13 }
 0x16b   : > { %p1478_p0 = pnand %p1477_p12, %p2025_p2 }
 0x16c   : > { %p1485_p10 = por %p1484_p8, %p1483_p1 }
 0x16d   : > { %p1479_p4 = pneg %p1478_p0 }
 0x16f   : > { %p1486_p11 = pnand %p1485_p10, %p1479_p4 }
 0x171   : > { %1489 = shalt.err (!%p1486_p11)
}
 0x172   : > { %s1490_s29 = scalar_lea.hbm %s1935_s19, 256  ;;  %s1494_s25 = scalar_lea.hbm %s1997_s11, 512 }
 0x173   : > { %p1491_p13 = scmp.ne.s32.totalorder %s1935_s19, %s1490_s29  ;;  %p1495_p6 = scmp.lt.u32.totalorder %s1935_s19, %s1997_s11 }
 0x174   : > { %p1496_p7 = scmp.lt.u32.totalorder %s1494_s25, %s1490_s29  ;;  %p1498_p12 = scmp.lt.u32.totalorder %s1490_s29, %s1935_s19 }
 0x175   : > { %p1492_p3 = pnand %p1491_p13, %p2025_p2 }
 0x176   : > { %p1497_p9 = por %p1496_p7, %p1495_p6 }
 0x177   : > { %p1493_p5 = pneg %p1492_p3 }
 0x178   : > { %p1499_p0 = por %p1498_p12, %p1497_p9 }
 0x17a   : > { %p1500_p4 = pnand %p1499_p0, %p1493_p5 }
 0x17c   : > { %1503 = shalt.err (!%p1500_p4)
}
 0x17d   : > { %1269 = dma.vmem_to_hbm [thread:$0]  (%p2025_p2), %s1929_s17, 256, %s1935_s19, %s1898_s28, %s1574_s30, %s1574_s30, %s1575_s21  }
 0x17e PF: > { %s2026_s24 = sld [smem:[#allocation18_spill]]  ;;  %s2027_s22 = sld [smem:[#allocation15_spill]] }
 0x17f   : > { %s2028_s13 = sld [smem:[#allocation20_spill]] }
 0x184   : > { %p1294_p1 = scmp.ge.s32.totalorder %s2026_s24, 2  ;;  %s951_s20 = sand.u32 1, %s2027_s22  }
 0x185   : > { %p2029_p8 = scmp.ne.s32.totalorder %s2028_s13, 0  ;;  %s952_s23 = scalar_lea.sflag [#allocation4], %s951_s20 }
 0x187   : > { %p1281_p10 = pnand %p1294_p1, %p2029_p8 }
 0x189   : > { %1537 = dma.done.wait (!%p1281_p10), %s952_s23, 256  }
 0x18a   : > { %1539 = vsyncadd (!%p1281_p10), %s952_s23, 4294967040  ;;  %s2030_s27 = sadd.s32 4294967294, %s2026_s24  }
 0x18b   : > { %s960_s14 = sand.u32 1, %s2030_s27  }
 0x18c   : > { %s961_s29 = scalar_lea.sflag [#allocation9], %s960_s14 }
 0x18d   : > { %1541 = dma.done.wait (!%p1281_p10), %s961_s29, 512  }
 0x18e   : > { %1543 = vsyncadd (!%p1281_p10), %s961_s29, 4294966784  ;;  %s30_s22 = sadd.s32 1, %s2026_s24   ;;  %s2031_s30 = sld [smem:[#allocation16_spill]] }
 0x18f   : > { %p27_p2 = scmp.ge.s32.totalorder %s30_s22, 4   ;;  %s2032_s19 = sld [smem:[#allocation21_spill]] }
 0x190   : > { %s2033_s20 = sld [smem:[#allocation17_spill]]  ;;  %s2034_s21 = sld [smem:[#allocation19_spill]] }
 0x191   : > { %s2035_s17 = smov %s1550_s18  ;;  %29 = sbr.rel (!%p27_p2) target bundleno = 8 (0x8), region = 138 }
 0x194   : > { %s2036_s18 = smov %s2031_s30 }
 0x198   :  { %975 = vsyncpa [#allocation3], 1 }
 0x199   :  { %977 = vsyncpa [#allocation3 + $0x1], 1 }
 0x19a   :  { %978 = vsyncpa [#allocation6], 1 }
 0x19b   :  { %979 = vsyncpa [#allocation4], 1 }
 0x19c   :  { %981 = vsyncpa [#allocation4 + $0x1], 1 }
 0x19d   :  { %982 = vsyncpa [#allocation9], 1 }
 0x19e   :  { %984 = vsyncpa [#allocation9 + $0x1], 1 }

</bundles_post_ra>
